<compile_context>
chip_gen: v7x
topology: tpu7x:2x2x1
jax: 0.10.0
libtpu: 0.0.40
codegen_flags: <defaults>
</compile_context>

<pallas_src>
import functools

import jax
import jax.numpy as jnp
from jax.experimental import pallas as pl
from jax.experimental.pallas import tpu as pltpu

LANE = 128
SUB = 8                     # f32 vreg sublanes
BLOCK_ROWS_MAX = 2048       # (2048, 128) f32 = 1 MiB per input buffer
NCORES = 2                  # parallel split (v7x megacore); harmless on 1-TC chips


def _bce_masked_kernel(x_ref, y_ref, loss_ref, mask_ref, *,
                       block_rows, per_core, n_true):
    c = pl.program_id(0)        # "parallel" (core) axis
    i = pl.program_id(1)        # "arbitrary" (reduction) axis

    # Zero this core's accumulators at the start of its reduction.
    @pl.when(i == 0)
    def _():
        loss_ref[...] = jnp.zeros_like(loss_ref)
        mask_ref[...] = jnp.zeros_like(mask_ref)

    x = x_ref[...]
    y = y_ref[...]

    # mask = (~(target > 1)).float()
    mask = jnp.where(y > 1.0, 0.0, 1.0)
    xm = x * mask
    ym = y * mask

    # Numerically stable BCE-with-logits, elementwise:
    #   l = max(x, 0) - x*y + log(1 + exp(-|x|))
    bce = jnp.maximum(xm, 0.0) - xm * ym + jnp.log1p(jnp.exp(-jnp.abs(xm)))

    # In-kernel validity: handles lane/row padding, the ragged last block and
    # the duplicated (index-clamped) block of the parallel split.
    # NOTE: int32 flat index assumes < 2^31 total elements.
    b = c * per_core + i                     # logical block index (may exceed range)
    row0 = b * block_rows
    rid = jax.lax.broadcasted_iota(jnp.int32, (block_rows, LANE), 0)
    lid = jax.lax.broadcasted_iota(jnp.int32, (block_rows, LANE), 1)
    flat = (row0 + rid) * LANE + lid
    valid = flat < n_true

    loss_e = jnp.where(valid, bce, 0.0)
    mask_e = jnp.where(valid, mask, 0.0)

    # VPU-only partial reduction: fold the block down to one (8, 128) tile
    # (reshape is layout-preserving for f32 (8,128) tiling; sum over the
    # leading axis is plain vector adds — no XLU in the steady state).
    loss_ref[...] += jnp.sum(loss_e.reshape(-1, SUB, LANE), axis=0)
    mask_ref[...] += jnp.sum(mask_e.reshape(-1, SUB, LANE), axis=0)


@jax.jit
def bce_with_logits_loss_masked(inp, tgt):
    """Pallas implementation of BCEWithLogitsLossMasked.forward."""
    x = inp.reshape(-1).astype(jnp.float32)
    y = tgt.reshape(-1).astype(jnp.float32)
    n = x.shape[0]

    # Pad only to a multiple of 8*128 so the row count is a multiple of 8.
    # For typical power-of-two NCHW sizes this is a no-op (pad == 0).
    chunk = SUB * LANE
    n_pad = ((n + chunk - 1) // chunk) * chunk
    pad = n_pad - n
    if pad:
        x = jnp.pad(x, (0, pad))
        y = jnp.pad(y, (0, pad))

    rows = n_pad // LANE
    x2 = x.reshape(rows, LANE)
    y2 = y.reshape(rows, LANE)

    block_rows = min(BLOCK_ROWS_MAX, rows)          # multiple of 8, or full extent
    total_blocks = -(-rows // block_rows)           # cdiv
    per_core = -(-total_blocks // NCORES)           # cdiv

    def in_map(c, i):
        # Clamp so the DMA window never leaves the array; the extra (duplicated)
        # iterations are fully masked out by the in-kernel validity test.
        b = c * per_core + i
        return (jnp.minimum(b, total_blocks - 1), 0)

    kernel = functools.partial(
        _bce_masked_kernel,
        block_rows=block_rows, per_core=per_core, n_true=n)

    loss_out, mask_out = pl.pallas_call(
        kernel,
        out_shape=(
            jax.ShapeDtypeStruct((NCORES * SUB, LANE), jnp.float32),
            jax.ShapeDtypeStruct((NCORES * SUB, LANE), jnp.float32),
        ),
        grid_spec=pltpu.PrefetchScalarGridSpec(
            num_scalar_prefetch=0,
            grid=(NCORES, per_core),
            in_specs=[
                pl.BlockSpec((block_rows, LANE), in_map),
                pl.BlockSpec((block_rows, LANE), in_map),
            ],
            out_specs=[
                pl.BlockSpec((SUB, LANE), lambda c, i: (c, 0)),
                pl.BlockSpec((SUB, LANE), lambda c, i: (c, 0)),
            ],
        ),
        compiler_params=pltpu.CompilerParams(
            dimension_semantics=("parallel", "arbitrary"),
        ),
    )(x2, y2)

    # Tiny epilogue: 2*(16,128) cross-lane reduce + the final division.
    loss_sum = jnp.sum(loss_out)
    mask_sum = jnp.sum(mask_out)
    return loss_sum / (mask_sum + 1e-12)


def _reference(inp, tgt):
    """Pure-JAX reference mirroring the PyTorch module."""
    x = inp.reshape(-1).astype(jnp.float32)
    y = tgt.reshape(-1).astype(jnp.float32)
    mask = jnp.where(y > 1.0, 0.0, 1.0)
    xm = x * mask
    ym = y * mask
    bce = jnp.maximum(xm, 0.0) - xm * ym + jnp.log1p(jnp.exp(-jnp.abs(xm)))
    return jnp.sum(bce) / (jnp.sum(mask) + 1e-12)


if __name__ == "__main__":
    key = jax.random.PRNGKey(0)
    k1, k2 = jax.random.split(key)

    # Small NCHW shapes consistent with typical use of this loss.
    x = jax.random.normal(k1, (2, 4, 16, 16), dtype=jnp.float32)   # logits
    # targets in {0, 1, 2}; 2 triggers the "ignore" mask (target > 1)
    t = jax.random.randint(k2, (2, 4, 16, 16), 0, 3).astype(jnp.float32)

    loss = bce_with_logits_loss_masked(x, t)
    jax.block_until_ready(loss)

    ref = _reference(x, t)
    assert jnp.allclose(loss, ref, rtol=1e-5, atol=1e-5), (loss, ref)

    print("KERNEL_OK")
</pallas_src>

<mosaic_0001>
module attributes {stable_mosaic.version = 11 : i64} {
  func.func @_bce_masked_kernel(%arg0: i32, %arg1: i32, %arg2: memref<16x128xf32, #tpu.memory_space<vmem>>, %arg3: memref<16x128xf32, #tpu.memory_space<vmem>>, %arg4: memref<8x128xf32, #tpu.memory_space<vmem>>, %arg5: memref<8x128xf32, #tpu.memory_space<vmem>>) attributes {dimension_semantics = [#tpu.dimension_semantics<parallel>, #tpu.dimension_semantics<arbitrary>], iteration_bounds = array<i64: 2, 1>, scalar_prefetch = 0 : i64, scratch_operands = 0 : i64, tpu.core_type = #tpu.core_type<tc>, window_params = [{transform_indices = @transform_0, window_bounds = array<i64: 16, 128>}, {transform_indices = @transform_1, window_bounds = array<i64: 16, 128>}, {transform_indices = @transform_2, window_bounds = array<i64: 8, 128>}, {transform_indices = @transform_3, window_bounds = array<i64: 8, 128>}]} {
    %c0_i32 = arith.constant 0 : i32
    %0 = arith.cmpi eq, %arg1, %c0_i32 : i32
    %1 = arith.extui %0 : i1 to i32
    %c0_i32_0 = arith.constant 0 : i32
    %2 = arith.cmpi ne, %1, %c0_i32_0 : i32
    scf.if %2 {
      %cst_20 = arith.constant 0.000000e+00 : f32
      %48 = vector.broadcast %cst_20 : f32 to vector<8x128xf32>
      %c0_21 = arith.constant 0 : index
      %c0_22 = arith.constant 0 : index
      %49 = vector.load %arg4[%c0_21, %c0_22] : memref<8x128xf32, #tpu.memory_space<vmem>>, vector<8x128xf32>
      tpu.vector_store %arg4[%c0_21, %c0_22], %48 {strides = array<i32>} : memref<8x128xf32, #tpu.memory_space<vmem>>, vector<8x128xf32>,
      %cst_23 = arith.constant 0.000000e+00 : f32
      %50 = vector.broadcast %cst_23 : f32 to vector<8x128xf32>
      %c0_24 = arith.constant 0 : index
      %c0_25 = arith.constant 0 : index
      %51 = vector.load %arg5[%c0_24, %c0_25] : memref<8x128xf32, #tpu.memory_space<vmem>>, vector<8x128xf32>
      tpu.vector_store %arg5[%c0_24, %c0_25], %50 {strides = array<i32>} : memref<8x128xf32, #tpu.memory_space<vmem>>, vector<8x128xf32>,
    } else {
    }
    %c0 = arith.constant 0 : index
    %c0_1 = arith.constant 0 : index
    %3 = vector.load %arg2[%c0, %c0_1] : memref<16x128xf32, #tpu.memory_space<vmem>>, vector<16x128xf32>
    %c0_2 = arith.constant 0 : index
    %c0_3 = arith.constant 0 : index
    %4 = vector.load %arg3[%c0_2, %c0_3] : memref<16x128xf32, #tpu.memory_space<vmem>>, vector<16x128xf32>
    %cst = arith.constant 1.000000e+00 : f32
    %5 = vector.broadcast %cst : f32 to vector<16x128xf32>
    %6 = arith.cmpf ogt, %4, %5 : vector<16x128xf32>
    %cst_4 = arith.constant 0.000000e+00 : f32
    %cst_5 = arith.constant 1.000000e+00 : f32
    %7 = vector.broadcast %cst_4 : f32 to vector<16x128xf32>
    %8 = vector.broadcast %cst_5 : f32 to vector<16x128xf32>
    %9 = arith.select %6, %7, %8 : vector<16x128xi1>, vector<16x128xf32>
    %10 = arith.mulf %3, %9 : vector<16x128xf32>
    %11 = arith.mulf %4, %9 : vector<16x128xf32>
    %cst_6 = arith.constant 0.000000e+00 : f32
    %12 = vector.broadcast %cst_6 : f32 to vector<16x128xf32>
    %13 = arith.maximumf %10, %12 : vector<16x128xf32>
    %14 = arith.mulf %10, %11 : vector<16x128xf32>
    %15 = arith.subf %13, %14 : vector<16x128xf32>
    %16 = math.absf %10 : vector<16x128xf32>
    %cst_7 = arith.constant 0.000000e+00 : f32
    %17 = vector.broadcast %cst_7 : f32 to vector<16x128xf32>
    %18 = arith.subf %17, %16 : vector<16x128xf32>
    %19 = math.exp %18 : vector<16x128xf32>
    %20 = math.log1p %19 : vector<16x128xf32>
    %21 = arith.addf %15, %20 : vector<16x128xf32>
    %c1_i32 = arith.constant 1 : i32
    %22 = arith.muli %arg0, %c1_i32 : i32
    %23 = arith.addi %22, %arg1 : i32
    %c16_i32 = arith.constant 16 : i32
    %24 = arith.muli %23, %c16_i32 : i32
    %25 = tpu.iota {dimensions = array<i32: 0>} : vector<16x128xi32>
    %26 = tpu.iota {dimensions = array<i32: 1>} : vector<16x128xi32>
    %27 = vector.broadcast %24 : i32 to vector<16x128xi32>
    %28 = arith.addi %27, %25 : vector<16x128xi32>
    %c128_i32 = arith.constant 128 : i32
    %29 = vector.broadcast %c128_i32 : i32 to vector<16x128xi32>
    %30 = arith.muli %28, %29 : vector<16x128xi32>
    %31 = arith.addi %30, %26 : vector<16x128xi32>
    %c2048_i32 = arith.constant 2048 : i32
    %32 = vector.broadcast %c2048_i32 : i32 to vector<16x128xi32>
    %33 = arith.cmpi slt, %31, %32 : vector<16x128xi32>
    %cst_8 = arith.constant 0.000000e+00 : f32
    %34 = vector.broadcast %cst_8 : f32 to vector<16x128xf32>
    %35 = arith.select %33, %21, %34 : vector<16x128xi1>, vector<16x128xf32>
    %cst_9 = arith.constant 0.000000e+00 : f32
    %36 = vector.broadcast %cst_9 : f32 to vector<16x128xf32>
    %37 = arith.select %33, %9, %36 : vector<16x128xi1>, vector<16x128xf32>
    %c0_10 = arith.constant 0 : index
    %c0_11 = arith.constant 0 : index
    %38 = vector.load %arg4[%c0_10, %c0_11] : memref<8x128xf32, #tpu.memory_space<vmem>>, vector<8x128xf32>
    %39 = vector.shape_cast %35 : vector<16x128xf32> to vector<2x8x128xf32>
    %cst_12 = arith.constant dense<0.000000e+00> : vector<8x128xf32>
    %40 = vector.multi_reduction <add>, %39, %cst_12 [0] : vector<2x8x128xf32> to vector<8x128xf32>
    %41 = arith.addf %38, %40 : vector<8x128xf32>
    %c0_13 = arith.constant 0 : index
    %c0_14 = arith.constant 0 : index
    %42 = vector.load %arg4[%c0_13, %c0_14] : memref<8x128xf32, #tpu.memory_space<vmem>>, vector<8x128xf32>
    tpu.vector_store %arg4[%c0_13, %c0_14], %41 {strides = array<i32>} : memref<8x128xf32, #tpu.memory_space<vmem>>, vector<8x128xf32>,
    %c0_15 = arith.constant 0 : index
    %c0_16 = arith.constant 0 : index
    %43 = vector.load %arg5[%c0_15, %c0_16] : memref<8x128xf32, #tpu.memory_space<vmem>>, vector<8x128xf32>
    %44 = vector.shape_cast %37 : vector<16x128xf32> to vector<2x8x128xf32>
    %cst_17 = arith.constant dense<0.000000e+00> : vector<8x128xf32>
    %45 = vector.multi_reduction <add>, %44, %cst_17 [0] : vector<2x8x128xf32> to vector<8x128xf32>
    %46 = arith.addf %43, %45 : vector<8x128xf32>
    %c0_18 = arith.constant 0 : index
    %c0_19 = arith.constant 0 : index
    %47 = vector.load %arg5[%c0_18, %c0_19] : memref<8x128xf32, #tpu.memory_space<vmem>>, vector<8x128xf32>
    tpu.vector_store %arg5[%c0_18, %c0_19], %46 {strides = array<i32>} : memref<8x128xf32, #tpu.memory_space<vmem>>, vector<8x128xf32>,
    return
  }
  func.func @transform_0(%arg0: i32, %arg1: i32) -> (i32, i32) {
    %c1_i32 = arith.constant 1 : i32
    %0 = arith.muli %arg0, %c1_i32 : i32
    %1 = arith.addi %0, %arg1 : i32
    %c0_i32 = arith.constant 0 : i32
    %2 = arith.minsi %1, %c0_i32 : i32
    %c0_i32_0 = arith.constant 0 : i32
    %c0_i32_1 = arith.constant 0 : i32
    return %2, %c0_i32_0 : i32, i32
  }
  func.func @transform_1(%arg0: i32, %arg1: i32) -> (i32, i32) {
    %c1_i32 = arith.constant 1 : i32
    %0 = arith.muli %arg0, %c1_i32 : i32
    %1 = arith.addi %0, %arg1 : i32
    %c0_i32 = arith.constant 0 : i32
    %2 = arith.minsi %1, %c0_i32 : i32
    %c0_i32_0 = arith.constant 0 : i32
    %c0_i32_1 = arith.constant 0 : i32
    return %2, %c0_i32_0 : i32, i32
  }
  func.func @transform_2(%arg0: i32, %arg1: i32) -> (i32, i32) {
    %c0_i32 = arith.constant 0 : i32
    %c0_i32_0 = arith.constant 0 : i32
    return %arg0, %c0_i32 : i32, i32
  }
  func.func @transform_3(%arg0: i32, %arg1: i32) -> (i32, i32) {
    %c0_i32 = arith.constant 0 : i32
    %c0_i32_0 = arith.constant 0 : i32
    return %arg0, %c0_i32 : i32, i32
  }
}

</mosaic_0001>

<bundles_post_ra>
// kernel: bce_with_logits_loss_masked.1
= control target key start
LH: loop header
LB: loop body
LE: loop exit
PB: predicated region body
PF: predicated region fallthrough
CT: control target
= control target key end

     0   :  { %s535_s12 = smov 0   ;;  %s537_s13 = smov 0   ;;  %s595_s0 = inlined_call_operand.vmem [shape: f32[16,128], index: 0, kind: input, shape index: {}]   ;;  %s596_s1 = inlined_call_operand.vmem [shape: f32[16,128], index: 1, kind: input, shape index: {}]   ;;  %s597_s2 = inlined_call_operand.vmem [shape: f32[16,128], index: 2, kind: output, shape index: {0}]   ;;  %s598_s3 = inlined_call_operand.vmem [shape: f32[16,128], index: 3, kind: output, shape index: {1}]  }
   0x1   :  { %s539_s14 = smov 0  }
   0x2 LB: > { %s26_s15 = sadd.s32 1, %s508_s13  ;;  %p446_p0 = scmp.ge.s32.totalorder %s512_s14, 1  ;;  %s512_s14 = sphi %s539_s14, %s14_s14   ;;  %s508_s13 = sphi %s537_s13, %s600_s13   ;;  %s504_s12 = sphi %s535_s12, %s599_s12  }
   0x3   : > { %p28_p1 = scmp.ge.s32.totalorder %s26_s15, 2  ;;  %p188_p2 = scmp.lt.s32.totalorder %s512_s14, 3 }
   0x5   : > { %s602_s15 = smov (%p28_p1, %s26_s15), 0  ;;  %p189_p3 = pnand %p446_p0, %p188_p2 }
   0x6   : > { %p227_p4 = scmp.lt.s32.totalorder (!%p189_p3), %s504_s12, 0  ;;  %v312_v0 = vlaneseq (!%p189_p3)  ;;  %s453_s16 = sshll.u32 (!%p189_p3), %s504_s12, 4  ;;  %v514_v15 = vmov (!%p189_p3), 1.0  }
   0x7   : > { %192 = sbr.rel (%p189_p3) target bundleno = 68 (0x44), region = 28  ;;  %v317_v2 = vstv (!%p189_p3), %s453_s16  ;;  %p250_p5 = scmp.lt.s32.totalorder (!%p189_p3), %s504_s12, 1 }
   0x8   : > { %v313_v1 = vshrl.u32 (!%p189_p3), %v312_v0, 7  ;;  %v316_v5 = vand.u32 (!%p189_p3), 127, %v312_v0 }
   0xa   : > { %v314_v3 = vadd.s32 (!%p189_p3), 8, %v313_v1  ;;  %v318_v4 = vadd.s32 (!%p189_p3), %v317_v2, %v313_v1 }
   0xc   : > { %v319_v6 = vadd.s32 (!%p189_p3), %v317_v2, %v314_v3  ;;  %v320_v7 = vmul.u32 (!%p189_p3), 128, %v318_v4 }
   0xe   : > { %s228_s17 = scalar_select %p227_p4, %s504_s12, 0  ;;  %v321_v8 = vmul.u32 128, %v319_v6  ;;  %v553_v9 = vadd.s32 %v320_v7, %v316_v5 }
   0xf   : > { %s606_s12 = smov (!%p250_p5, %s504_s12), 1 }
  0x10   : > { %s447_s18 = sshll.u32 %s228_s17, 1  ;;  %v557_v10 = vadd.s32 %v321_v8, %v316_v5  ;;  %vm324_vm0 = vcmp.lt.s32.totalorder %v553_v9, 2048  ;;  %s451_s26 = sshll.u32 %s606_s12, 3 }
  0x11   : > { %p230_p6 = scmp.lt.s32.totalorder %s447_s18, 1  ;;  %s257_s29 = scalar_lea.vmem %s598_s3, %s451_s26 }
  0x12   : > { %vm325_vm2 = vcmp.lt.s32.totalorder %v557_v10, 2048  ;;  %s253_s5 = scalar_lea.vmem %s597_s2, %s451_s26 }
  0x13   : > { %s604_s18 = smov (!%p230_p6, %s447_s18), 1 }
  0x14   : > { %s448_s19 = sshll.u32 %s604_s18, 3 }
  0x15   : > { %s233_s22 = scalar_lea.vmem %s595_s0, %s448_s19  ;;  %s245_s25 = scalar_lea.vmem %s596_s1, %s448_s19 }
  0x16   : > { %v264_v11 = vld [vmem:[%s233_s22] sm:$0xff]  ;;  %v265_v13 = vld [vmem:[%s233_s22 + $0x8] sm:$0xff] }
  0x17   : > { %v266_v12 = vld [vmem:[%s245_s25] sm:$0xff]  ;;  %v267_v14 = vld [vmem:[%s245_s25 + $0x8] sm:$0xff] }
  0x18   : > { %vm268_vm1 = vcmp.gt.f32.partialorder %v266_v12, 1.0  ;;  %vm269_vm3 = vcmp.gt.f32.partialorder %v267_v14, 1.0 }
  0x19   : > { %v270_v16 = vsel %vm268_vm1, 0.0, %v514_v15  ;;  %v271_v17 = vsel %vm269_vm3, 0.0, %v514_v15 }
  0x1a   : > { %v272_v18 = vmul.f32 %v270_v16, %v264_v11  ;;  %v328_v19 = vsel %vm324_vm0, %v270_v16, 0.0  ;;  %v273_v20 = vmul.f32 %v271_v17, %v265_v13  ;;  %v329_v21 = vsel %vm325_vm2, %v271_v17, 0.0 }
  0x1b   : > { %v335_v23 = vadd.f32 %v329_v21, %v328_v19  ;;  %v274_v34 = vmul.f32 %v270_v16, %v266_v12  ;;  %v275_v36 = vmul.f32 %v271_v17, %v267_v14 }
  0x1c   : > { %v282_v22 = vand.u32 2147483647, %v272_v18  ;;  %v283_v24 = vand.u32 2147483647, %v273_v20  ;;  %v276_v38 = vmax.f32 %v272_v18, 0.0  ;;  %v277_v42 = vmax.f32 %v273_v20, 0.0 }
  0x1d   : > { %337 = vst [vmem:[%s257_s29] sm:$0xff] %v335_v23  ;;  %v278_v39 = vmul.f32 %v274_v34, %v272_v18  ;;  %v279_v43 = vmul.f32 %v275_v36, %v273_v20 }
  0x1e   : > { %v284_v25 = vsub.f32 0.0, %v282_v22  ;;  %v285_v26 = vsub.f32 0.0, %v283_v24 }
  0x1f   : > { %v280_v47 = vsub.f32 %v276_v38, %v278_v39  ;;  %v281_v50 = vsub.f32 %v277_v42, %v279_v43 }
  0x20   : > { %v286_v27 = vmul.f32 1.442695, %v284_v25  ;;  %v288_v28 = vmul.f32 1.442695, %v285_v26 }
  0x22   : > { %482 = vpow2.f32 %v286_v27 }
  0x23   : > { %484 = vpow2.f32 %v288_v28 }
  0x2c   : > { %v483_v29 = vpop.eup %482 }
  0x2d   : > { %v485_v30 = vpop.eup %484  ;;  %v290_v31 = vadd.f32 1.0, %v483_v29  ;;  %v293_v33 = vmul.f32 -0.5, %v483_v29  ;;  %v296_v40 = vand.u32 2147483647, %v483_v29 }
  0x2e   : > { %v299_v32 = vadd.f32 1.0, %v485_v30  ;;  %v302_v35 = vmul.f32 -0.5, %v485_v30  ;;  %v305_v44 = vand.u32 2147483647, %v485_v30 }
  0x2f   : > { %486 = vlog2.f32 %v290_v31  ;;  %v294_v37 = vadd.f32 1.0, %v293_v33  ;;  %vm297_vm4 = vcmp.lt.f32.partialorder %v296_v40, 0.0004427343 }
  0x30   : > { %488 = vlog2.f32 %v299_v32  ;;  %v303_v41 = vadd.f32 1.0, %v302_v35  ;;  %vm306_vm5 = vcmp.lt.f32.partialorder %v305_v44, 0.0004427343 }
  0x31   : > { %v295_v45 = vmul.f32 %v483_v29, %v294_v37 }
  0x32   : > { %v304_v48 = vmul.f32 %v485_v30, %v303_v41 }
  0x39   : > { %v487_v46 = vpop.eup %486 }
  0x3a   : > { %v489_v49 = vpop.eup %488  ;;  %v292_v51 = vmul.f32 0.6931472, %v487_v46 }
  0x3b   : > { %v301_v52 = vmul.f32 0.6931472, %v489_v49 }
  0x3c   : > { %v298_v53 = vsel %vm297_vm4, %v295_v45, %v292_v51 }
  0x3d   : > { %v307_v54 = vsel %vm306_vm5, %v304_v48, %v301_v52  ;;  %v308_v55 = vadd.f32 %v298_v53, %v280_v47 }
  0x3e   : > { %v309_v56 = vadd.f32 %v307_v54, %v281_v50 }
  0x3f   : > { %v326_v57 = vsel %vm324_vm0, %v308_v55, 0.0 }
  0x40   : > { %v327_v58 = vsel %vm325_vm2, %v309_v56, 0.0 }
  0x41   : > { %v331_v59 = vadd.f32 %v327_v58, %v326_v57 }
  0x43   : > { %333 = vst [vmem:[%s253_s5] sm:$0xff] %v331_v59 }
  0x44 PF: > { %s14_s14 = sadd.s32 1, %s512_s14   ;;  %s599_s12 = smov %s508_s13 }
  0x45   : > { %p11_p7 = scmp.ge.s32.totalorder %s14_s14, 4   ;;  %s600_s13 = smov %s602_s15 }
  0x47   :  { %13 = sbr.rel (!%p11_p7) target bundleno = 2 (0x2), region = 77 }

</bundles_post_ra>
